<compile_context>
chip_gen: v5e
topology: v5e:2x2
jax: 0.10.0
libtpu: 0.0.40
codegen_flags: <defaults>
</compile_context>

<pallas_src>
import jax
import jax.numpy as jnp
from jax.experimental import pallas as pl
from jax.experimental.pallas import tpu as pltpu


# ----------------------------------------------------------------------------
# Pass 1: fused 1x1-conv projections (h, g, f), once per element of x.
# ----------------------------------------------------------------------------
def _proj_kernel(x_ref, w_ref, b_ref, h_ref, g_ref, f_ref):
    """One (batch, N-tile) grid step.

    x_ref : (1, C, tn)        input block (channels-major, N on lanes)
    w_ref : (C + 2*Cfp, C)    stacked [Wh^T ; Wg^T ; Wf^T]
    b_ref : (C + 2*Cfp, 1)    f32 bias column
    h_ref : (1, C,   tn)      h = Wh^T x + bh
    g_ref : (1, Cfp, tn)      g = Wg^T x + bg   (padded filter rows are 0)
    f_ref : (1, Cfp, tn)      f = Wf^T x + bf   (padded filter rows are 0)
    """
    C = h_ref.shape[1]
    Cfp = g_ref.shape[1]
    proj = jnp.dot(w_ref[...], x_ref[0],
                   preferred_element_type=jnp.float32) + b_ref[...]
    # Slice boundaries C and C+Cfp are multiples of 8 (sublane aligned).
    h_ref[0] = proj[:C].astype(h_ref.dtype)
    g_ref[0] = proj[C:C + Cfp].astype(g_ref.dtype)
    f_ref[0] = proj[C + Cfp:].astype(f_ref.dtype)


# ----------------------------------------------------------------------------
# Pass 2: flash-style attention (online softmax over key tiles).
# ----------------------------------------------------------------------------
def _attn_kernel(g_ref, f_ref, h_ref, xq_ref, gamma_ref, o_ref,
                 m_scr, l_scr, acc_scr):
    """One (batch, query-tile, key-tile) grid step.

    g_ref  : (1, Cfp, tq)   precomputed g for the current query tile
    f_ref  : (1, Cfp, tk)   precomputed f for the current key tile
    h_ref  : (1, C,   tk)   precomputed h for the current key tile
    xq_ref : (1, C,   tq)   x block for the residual
    gamma_ref : (1,)        f32 scalar in SMEM
    o_ref  : (1, C,   tq)   output block (lane-dense along N)
    scratch: m/l (1, tq) f32 softmax stats; acc (C, tq) f32 accumulator
    """
    kj = pl.program_id(2)
    cdt = h_ref.dtype

    @pl.when(kj == 0)
    def _init():
        m_scr[...] = jnp.full(m_scr.shape, -jnp.inf, dtype=jnp.float32)
        l_scr[...] = jnp.zeros(l_scr.shape, dtype=jnp.float32)
        acc_scr[...] = jnp.zeros(acc_scr.shape, dtype=jnp.float32)

    # Scores, keys on sublanes / queries on lanes:
    #   s[j, i] = sum_k f[k, j] * g[k, i]   (== torch s[i, j])
    # (Padded filter channels of f/g are zero, so they add nothing.)
    s = jax.lax.dot_general(f_ref[0], g_ref[0], (((0,), (0,)), ((), ())),
                            preferred_element_type=jnp.float32)     # (tk, tq)

    # Online softmax over the key axis (sublane axis of s).
    m_prev = m_scr[...]                                              # (1, tq)
    m_new = jnp.maximum(m_prev, jnp.max(s, axis=0, keepdims=True))
    alpha = jnp.exp(m_prev - m_new)                                  # (1, tq)
    p = jnp.exp(s - m_new)                                           # (tk, tq)
    l_scr[...] = alpha * l_scr[...] + jnp.sum(p, axis=0, keepdims=True)
    # o accumulation: acc[c, i] += sum_j h[c, j] * p[j, i]  (plain matmul).
    acc_scr[...] = alpha * acc_scr[...] + jnp.dot(
        h_ref[0], p.astype(cdt), preferred_element_type=jnp.float32)  # (C, tq)
    m_scr[...] = m_new

    # Finalize on the last key tile: normalize (exact divide), gamma, residual.
    @pl.when(kj == pl.num_programs(2) - 1)
    def _finalize():
        out = gamma_ref[0] * (acc_scr[...] / l_scr[...]) \
            + xq_ref[0].astype(jnp.float32)
        o_ref[0] = out.astype(o_ref.dtype)


# ----------------------------------------------------------------------------
# Tile selection (VMEM-aware; grow tq before tk).
# ----------------------------------------------------------------------------
def _choose_attn_tiles(n, c, cfp, itemsize,
                       budget_bytes=40 * 1024 * 1024):
    """Pick (tq, tk): prefer the largest query tile, then largest key tile,
    subject to a per-step VMEM estimate staying under `budget_bytes`
    (kept below the 48 MiB vmem_limit, the v7x tight case)."""
    tq_cands = [t for t in (1024, 512, 256, 128) if n % t == 0] or [n]
    tk_cands = [t for t in (512, 256, 128) if n % t == 0] or [n]

    def est(tq, tk):
        # double-buffered input/output blocks
        inp = 2 * itemsize * (cfp * tq + cfp * tk + c * tk + c * tq)
        out = 2 * itemsize * c * tq
        scratch = 4 * (c * tq + 2 * tq)
        live = 4 * 2 * tk * tq          # s and p f32 temporaries
        return inp + out + scratch + live

    for tq in tq_cands:
        for tk in tk_cands:
            if est(tq, tk) <= budget_bytes:
                return tq, tk
    return tq_cands[-1], tk_cands[-1]


def _pick_proj_tile(n):
    for t in (512, 256, 128):
        if n % t == 0:
            return t
    return n


# ----------------------------------------------------------------------------
# Wrapper.
# ----------------------------------------------------------------------------
def self_attention_pallas(x_nchw, wf, wg, wh, bf, bg, bh, gamma,
                          *, tq=None, tk=None):
    """SAGAN self-attention forward.

    x_nchw: (B, C, W, H).  wf/wg: (C, C//8), wh: (C, C) (1x1-conv weights,
    input-channel-major); bf/bg: (1, C//8), bh: (1, C); gamma: 1 element.
    Returns (B, C, W, H) in x's dtype.
    """
    B, C, W, H = x_nchw.shape
    N = W * H
    Cf = wf.shape[1]
    assert C % 8 == 0, "channel count must be a multiple of 8"

    dt = x_nchw.dtype
    itemsize = jnp.dtype(dt).itemsize

    # Pad the filter dim Cf -> Cfp (multiple of 8) with zero weights/biases so
    # every channel slice is sublane aligned; padded channels are exactly 0
    # and contribute nothing to the scores.
    Cfp = max(8, ((Cf + 7) // 8) * 8)
    wg_p = jnp.pad(jnp.asarray(wg), ((0, 0), (0, Cfp - Cf)))
    wf_p = jnp.pad(jnp.asarray(wf), ((0, 0), (0, Cfp - Cf)))
    bg_p = jnp.pad(jnp.asarray(bg, jnp.float32).reshape(-1), (0, Cfp - Cf))
    bf_p = jnp.pad(jnp.asarray(bf, jnp.float32).reshape(-1), (0, Cfp - Cf))

    # Stacked projection weights [Wh^T ; Wg^T ; Wf^T] in the input dtype
    # (bf16 inputs -> bf16 MXU operands with f32 accumulation).
    w_all = jnp.concatenate([jnp.asarray(wh).T, wg_p.T, wf_p.T],
                            axis=0).astype(dt)                       # (C+2Cfp, C)
    b_all = jnp.concatenate(
        [jnp.asarray(bh, jnp.float32).reshape(-1), bg_p, bf_p]
    ).reshape(-1, 1)                                                  # (C+2Cfp, 1)
    gamma_s = jnp.asarray(gamma, jnp.float32).reshape(1)

    # Free reshape (same memory layout): (B, C, W, H) -> (B, C, N).
    x_flat = x_nchw.reshape(B, C, N)

    vmem_limit = 48 * 1024 * 1024   # below v7x's 64 MiB physical VMEM

    # ---------------- Pass 1: projections, once per element of x -----------
    tn = _pick_proj_tile(N)
    h_all, g_all, f_all = pl.pallas_call(
        _proj_kernel,
        out_shape=(jax.ShapeDtypeStruct((B, C, N), dt),
                   jax.ShapeDtypeStruct((B, Cfp, N), dt),
                   jax.ShapeDtypeStruct((B, Cfp, N), dt)),
        grid_spec=pltpu.PrefetchScalarGridSpec(
            num_scalar_prefetch=0,
            grid=(B, N // tn),
            in_specs=[
                pl.BlockSpec((1, C, tn), lambda b, ni: (b, 0, ni)),     # x
                pl.BlockSpec((C + 2 * Cfp, C), lambda b, ni: (0, 0)),   # W stack
                pl.BlockSpec((C + 2 * Cfp, 1), lambda b, ni: (0, 0)),   # bias
            ],
            out_specs=[
                pl.BlockSpec((1, C, tn), lambda b, ni: (b, 0, ni)),     # h
                pl.BlockSpec((1, Cfp, tn), lambda b, ni: (b, 0, ni)),   # g
                pl.BlockSpec((1, Cfp, tn), lambda b, ni: (b, 0, ni)),   # f
            ],
        ),
        compiler_params=pltpu.CompilerParams(
            dimension_semantics=("parallel", "parallel"),
            vmem_limit_bytes=vmem_limit,
        ),
    )(x_flat, w_all, b_all)

    # ---------------- Pass 2: flash-style attention -------------------------
    if tq is None or tk is None:
        tq_auto, tk_auto = _choose_attn_tiles(N, C, Cfp, itemsize)
        tq = tq_auto if tq is None else tq
        tk = tk_auto if tk is None else tk
    assert N % tq == 0 and N % tk == 0

    out_flat = pl.pallas_call(
        _attn_kernel,
        out_shape=jax.ShapeDtypeStruct((B, C, N), dt),
        grid_spec=pltpu.PrefetchScalarGridSpec(
            num_scalar_prefetch=0,
            grid=(B, N // tq, N // tk),
            in_specs=[
                pl.BlockSpec((1, Cfp, tq), lambda b, qi, kj: (b, 0, qi)),  # g (query)
                pl.BlockSpec((1, Cfp, tk), lambda b, qi, kj: (b, 0, kj)),  # f (key)
                pl.BlockSpec((1, C, tk), lambda b, qi, kj: (b, 0, kj)),    # h (key)
                pl.BlockSpec((1, C, tq), lambda b, qi, kj: (b, 0, qi)),    # x (residual)
                pl.BlockSpec(memory_space=pltpu.MemorySpace.SMEM),         # gamma
            ],
            out_specs=pl.BlockSpec((1, C, tq), lambda b, qi, kj: (b, 0, qi)),
            scratch_shapes=[
                pltpu.VMEM((1, tq), jnp.float32),    # running max m
                pltpu.VMEM((1, tq), jnp.float32),    # running sum l
                pltpu.VMEM((C, tq), jnp.float32),    # o accumulator
            ],
        ),
        compiler_params=pltpu.CompilerParams(
            dimension_semantics=("parallel", "parallel", "arbitrary"),
            vmem_limit_bytes=vmem_limit,
        ),
    )(g_all, f_all, h_all, x_flat, gamma_s)

    # Free reshape back to NCHW.
    return out_flat.reshape(B, C, W, H)


# ----------------------------------------------------------------------------
# Pure-JAX f32 reference mirroring the PyTorch forward exactly (NCHW).
# ----------------------------------------------------------------------------
def self_attention_ref(x_nchw, wf, wg, wh, bf, bg, bh, gamma):
    B, C, W, H = x_nchw.shape
    N = W * H
    xf = x_nchw.reshape(B, C, N).astype(jnp.float32)
    f = jnp.einsum("bcp,ck->bkp", xf, wf.astype(jnp.float32)) + bf.reshape(1, -1, 1)
    g = jnp.einsum("bcp,ck->bkp", xf, wg.astype(jnp.float32)) + bg.reshape(1, -1, 1)
    h = jnp.einsum("bcp,ck->bkp", xf, wh.astype(jnp.float32)) + bh.reshape(1, -1, 1)
    s = jnp.einsum("bki,bkj->bij", g, f)                 # bmm(g^T, f)
    beta = jax.nn.softmax(s, axis=-1)
    o = jnp.einsum("bcj,bij->bci", h, beta)              # bmm(h, beta^T)
    out = gamma.reshape(()).astype(jnp.float32) * o + xf
    return out.reshape(B, C, W, H)


if __name__ == "__main__":
    key = jax.random.PRNGKey(0)
    B, C, W, H = 2, 32, 8, 8          # channels must be a multiple of 8
    Cf = C // 8

    k = jax.random.split(key, 8)
    x = jax.random.normal(k[0], (B, C, W, H), dtype=jnp.float32)
    wf = jax.random.normal(k[1], (C, Cf), dtype=jnp.float32) * 0.1
    wg = jax.random.normal(k[2], (C, Cf), dtype=jnp.float32) * 0.1
    wh = jax.random.normal(k[3], (C, C), dtype=jnp.float32) * 0.1
    bf = jax.random.normal(k[4], (1, Cf), dtype=jnp.float32) * 0.1
    bg = jax.random.normal(k[5], (1, Cf), dtype=jnp.float32) * 0.1
    bh = jax.random.normal(k[6], (1, C), dtype=jnp.float32) * 0.1
    gamma = jnp.full((1, 1), 0.5, dtype=jnp.float32)   # nonzero to exercise the path

    # f32 input path.
    out = jax.block_until_ready(
        self_attention_pallas(x, wf, wg, wh, bf, bg, bh, gamma))
    ref = self_attention_ref(x, wf, wg, wh, bf, bg, bh, gamma)
    assert out.shape == (B, C, W, H)
    assert out.dtype == x.dtype
    assert jnp.allclose(out.astype(jnp.float32), ref, atol=1e-2, rtol=1e-2), \
        "f32 mismatch vs reference"

    # bf16 input path: bf16 MXU operands with f32 accumulation.
    xb = x.astype(jnp.bfloat16)
    out_b = jax.block_until_ready(
        self_attention_pallas(xb, wf, wg, wh, bf, bg, bh, gamma))
    r = lambda a: a.astype(jnp.bfloat16).astype(jnp.float32)   # bf16-round for fair ref
    ref_b = self_attention_ref(r(x), r(wf), r(wg), r(wh), bf, bg, bh, gamma)
    assert out_b.dtype == jnp.bfloat16
    assert jnp.allclose(out_b.astype(jnp.float32), ref_b, atol=1e-1, rtol=1e-1), \
        "bf16 mismatch vs reference"

    print("KERNEL_OK")
</pallas_src>

<mosaic_0001>
module attributes {stable_mosaic.version = 11 : i64} {
  func.func @_proj_kernel(%arg0: i32, %arg1: i32, %arg2: memref<1x32x64xf32, #tpu.memory_space<vmem>>, %arg3: memref<48x32xf32, #tpu.memory_space<vmem>>, %arg4: memref<48x1xf32, #tpu.memory_space<vmem>>, %arg5: memref<1x32x64xf32, #tpu.memory_space<vmem>>, %arg6: memref<1x8x64xf32, #tpu.memory_space<vmem>>, %arg7: memref<1x8x64xf32, #tpu.memory_space<vmem>>) attributes {dimension_semantics = [#tpu.dimension_semantics<parallel>, #tpu.dimension_semantics<parallel>], iteration_bounds = array<i64: 2, 1>, scalar_prefetch = 0 : i64, scratch_operands = 0 : i64, tpu.core_type = #tpu.core_type<tc>, window_params = [{transform_indices = @transform_0, window_bounds = array<i64: 1, 32, 64>}, {pipeline_mode = #tpu.pipeline_mode<synchronous>, transform_indices = @transform_1, window_bounds = array<i64: 48, 32>}, {pipeline_mode = #tpu.pipeline_mode<synchronous>, transform_indices = @transform_2, window_bounds = array<i64: 48, 1>}, {transform_indices = @transform_3, window_bounds = array<i64: 1, 32, 64>}, {transform_indices = @transform_4, window_bounds = array<i64: 1, 8, 64>}, {transform_indices = @transform_5, window_bounds = array<i64: 1, 8, 64>}]} {
    %c0 = arith.constant 0 : index
    %c0_0 = arith.constant 0 : index
    %0 = vector.load %arg3[%c0, %c0_0] : memref<48x32xf32, #tpu.memory_space<vmem>>, vector<48x32xf32>
    %c0_1 = arith.constant 0 : index
    %c0_2 = arith.constant 0 : index
    %c0_3 = arith.constant 0 : index
    %1 = vector.load %arg2[%c0_1, %c0_2, %c0_3] : memref<1x32x64xf32, #tpu.memory_space<vmem>>, vector<1x32x64xf32>
    %2 = vector.shape_cast %1 : vector<1x32x64xf32> to vector<32x64xf32>
    %cst = arith.constant dense<0.000000e+00> : vector<48x64xf32>
    %3 = tpu.matmul %0, %2, %cst {dimension_numbers = #tpu.dot_dimension_numbers<[1], [0], [0], [1], [0, 0, 1, 1], [], []>} : vector<48x32xf32>, vector<32x64xf32>, vector<48x64xf32> -> vector<48x64xf32>
    %c0_4 = arith.constant 0 : index
    %c0_5 = arith.constant 0 : index
    %4 = vector.load %arg4[%c0_4, %c0_5] : memref<48x1xf32, #tpu.memory_space<vmem>>, vector<48x1xf32>
    %5 = vector.broadcast %4 : vector<48x1xf32> to vector<48x64xf32>
    %6 = arith.addf %3, %5 : vector<48x64xf32>
    %7 = vector.extract_strided_slice %6 {offsets = [0, 0], sizes = [32, 64], strides = [1, 1]} : vector<48x64xf32> to vector<32x64xf32>
    %c0_6 = arith.constant 0 : index
    %c0_7 = arith.constant 0 : index
    %c0_8 = arith.constant 0 : index
    %8 = vector.load %arg5[%c0_6, %c0_7, %c0_8] : memref<1x32x64xf32, #tpu.memory_space<vmem>>, vector<1x32x64xf32>
    %9 = vector.shape_cast %8 : vector<1x32x64xf32> to vector<32x64xf32>
    %10 = vector.shape_cast %7 : vector<32x64xf32> to vector<1x32x64xf32>
    tpu.vector_store %arg5[%c0_6, %c0_7, %c0_8], %10 {strides = array<i32>} : memref<1x32x64xf32, #tpu.memory_space<vmem>>, vector<1x32x64xf32>,
    %11 = vector.extract_strided_slice %6 {offsets = [32, 0], sizes = [8, 64], strides = [1, 1]} : vector<48x64xf32> to vector<8x64xf32>
    %c0_9 = arith.constant 0 : index
    %c0_10 = arith.constant 0 : index
    %c0_11 = arith.constant 0 : index
    %12 = vector.load %arg6[%c0_9, %c0_10, %c0_11] : memref<1x8x64xf32, #tpu.memory_space<vmem>>, vector<1x8x64xf32>
    %13 = vector.shape_cast %12 : vector<1x8x64xf32> to vector<8x64xf32>
    %14 = vector.shape_cast %11 : vector<8x64xf32> to vector<1x8x64xf32>
    tpu.vector_store %arg6[%c0_9, %c0_10, %c0_11], %14 {strides = array<i32>} : memref<1x8x64xf32, #tpu.memory_space<vmem>>, vector<1x8x64xf32>,
    %15 = vector.extract_strided_slice %6 {offsets = [40, 0], sizes = [8, 64], strides = [1, 1]} : vector<48x64xf32> to vector<8x64xf32>
    %c0_12 = arith.constant 0 : index
    %c0_13 = arith.constant 0 : index
    %c0_14 = arith.constant 0 : index
    %16 = vector.load %arg7[%c0_12, %c0_13, %c0_14] : memref<1x8x64xf32, #tpu.memory_space<vmem>>, vector<1x8x64xf32>
    %17 = vector.shape_cast %16 : vector<1x8x64xf32> to vector<8x64xf32>
    %18 = vector.shape_cast %15 : vector<8x64xf32> to vector<1x8x64xf32>
    tpu.vector_store %arg7[%c0_12, %c0_13, %c0_14], %18 {strides = array<i32>} : memref<1x8x64xf32, #tpu.memory_space<vmem>>, vector<1x8x64xf32>,
    return
  }
  func.func @transform_0(%arg0: i32, %arg1: i32) -> (i32, i32, i32) {
    %c0_i32 = arith.constant 0 : i32
    %c0_i32_0 = arith.constant 0 : i32
    return %arg0, %c0_i32, %arg1 : i32, i32, i32
  }
  func.func @transform_1(%arg0: i32, %arg1: i32) -> (i32, i32) {
    %c0_i32 = arith.constant 0 : i32
    %c0_i32_0 = arith.constant 0 : i32
    %c0_i32_1 = arith.constant 0 : i32
    return %c0_i32, %c0_i32_0 : i32, i32
  }
  func.func @transform_2(%arg0: i32, %arg1: i32) -> (i32, i32) {
    %c0_i32 = arith.constant 0 : i32
    %c0_i32_0 = arith.constant 0 : i32
    %c0_i32_1 = arith.constant 0 : i32
    return %c0_i32, %c0_i32_0 : i32, i32
  }
  func.func @transform_3(%arg0: i32, %arg1: i32) -> (i32, i32, i32) {
    %c0_i32 = arith.constant 0 : i32
    %c0_i32_0 = arith.constant 0 : i32
    return %arg0, %c0_i32, %arg1 : i32, i32, i32
  }
  func.func @transform_4(%arg0: i32, %arg1: i32) -> (i32, i32, i32) {
    %c0_i32 = arith.constant 0 : i32
    %c0_i32_0 = arith.constant 0 : i32
    return %arg0, %c0_i32, %arg1 : i32, i32, i32
  }
  func.func @transform_5(%arg0: i32, %arg1: i32) -> (i32, i32, i32) {
    %c0_i32 = arith.constant 0 : i32
    %c0_i32_0 = arith.constant 0 : i32
    return %arg0, %c0_i32, %arg1 : i32, i32, i32
  }
}

</mosaic_0001>

<bundles_post_ra>
// kernel: tpu_custom_call.1
= control target key start
LH: loop header
LB: loop body
LE: loop exit
PB: predicated region body
PF: predicated region fallthrough
CT: control target
= control target key end

     0   :  { %s1074_s0 = inlined_call_operand.vmem [shape: f32[2,32,64], index: 0, kind: input, shape index: {}]   ;;  %s1075_s1 = inlined_call_operand.vmem [shape: f32[48,32], index: 1, kind: input, shape index: {}]   ;;  %s1076_s2 = inlined_call_operand.vmem [shape: f32[48,1], index: 2, kind: input, shape index: {}]   ;;  %s1077_s3 = inlined_call_operand.hbm [shape: f32[2,32,64], index: 3, kind: output, shape index: {0}]   ;;  %s1078_s4 = inlined_call_operand.hbm [shape: f32[2,8,64], index: 4, kind: output, shape index: {1}]   ;;  %s1079_s5 = inlined_call_operand.hbm [shape: f32[2,8,64], index: 5, kind: output, shape index: {2}]  }
   0x1   :  { %1081 = sst [smem:[#allocation9_spill]] %s1074_s0 }
   0x2   :  { %1082 = sst [smem:[#allocation10_spill]] %s1075_s1 }
   0x3   :  { %1083 = sst [smem:[#allocation11_spill]] %s1076_s2 }
   0x4   :  { %11 = vsyncpa [#allocation3], 0 }
   0x5   :  { %13 = vsyncpa [#allocation3 + $0x1], 0 }
   0x6   :  { %14 = vsyncpa [#allocation5], 0 }
   0x7   :  { %16 = vsyncpa [#allocation5 + $0x1], 0  ;;  %s860_s18 = smov 0   ;;  %s862_s19 = smov 0  }
   0x8   :  { %s864_s20 = smov 0   ;;  %s866_s21 = smov 0  }
   0x9   :  { %s868_s22 = smov 0   ;;  %s870_s23 = smov 0  }
   0xa LB: > { %s577_s24 = sadd.s32 4294967295, %s825_s23   ;;  %s1080_s25 = sadd.s32 4294967294, %s825_s23   ;;  %s825_s23 = sphi %s870_s23, %s22_s23   ;;  %s821_s22 = sphi %s868_s22, %s1095_s22   ;;  %s817_s21 = sphi %s866_s21, %s1094_s21   ;;  %s813_s20 = sphi %s864_s20, %s1093_s20   ;;  %s809_s19 = sphi %s862_s19, %s1092_s19   ;;  %s805_s18 = sphi %s860_s18, %s1091_s18  }
   0xb   : > { %s34_s26 = sadd.s32 1, %s821_s22  ;;  %s113_s27 = sadd.s32 1, %s813_s20 }
   0xc   : > { %p36_p0 = scmp.ge.s32.totalorder %s34_s26, 2  ;;  %p123_p1 = scmp.ne.s32.totalorder %s813_s20, %s809_s19 }
   0xd   : > { %p124_p2 = scmp.eq.s32.totalorder %s577_s24, 1  ;;  %p129_p3 = scmp.ne.s32.totalorder %s809_s19, %s805_s18 }
   0xe   : > { %s1097_s26 = smov (%p36_p0, %s34_s26), 0  ;;  %p130_p5 = scmp.eq.s32.totalorder %s1080_s25, 1 }
   0xf   : > { %p902_p4 = por %p124_p2, %p123_p1  ;;  %s108_s29 = ssub.s32 %s821_s22, %s1097_s26 }
  0x10   : > { %p581_p6 = scmp.ge.s32.totalorder %s825_s23, 1  ;;  %p111_p7 = scmp.eq.s32.totalorder %s108_s29, 0 }
  0x11   : > { %p911_p8 = por %p130_p5, %p129_p3  ;;  %p221_p9 = scmp.lt.s32.totalorder %s825_s23, 3 }
  0x12   : > { %s917_s6 = scalar_select %p111_p7, %s813_s20, %s113_s27  }
  0x13   : > { %p222_p10 = pnand %p581_p6, %p221_p9 }
  0x14   : > { %p262_p11 = scmp.lt.s32.totalorder (!%p222_p10), %s817_s21, 1  ;;  %s1086_s2 = sld [smem:[#allocation11_spill]] (!%p222_p10) }
  0x15   : > { %225 = sbr.rel (%p222_p10) target bundleno = 204 (0xcc), region = 32  ;;  %s1087_s0 = sld [smem:[#allocation9_spill]] (!%p222_p10) }
  0x16   : > { %s1088_s1 = sld [smem:[#allocation10_spill]] (!%p222_p10)  ;;  %s967_s10 = sand.u32 (!%p222_p10), 1, %s809_s19  }
  0x17   : > { %s582_s11 = sshll.u32 (!%p222_p10), %s967_s10, 5  ;;  %s583_s12 = sshll.u32 (!%p222_p10), %s967_s10, 3 }
  0x18   : > { %s598_s13 = sshll.u32 (!%p222_p10), %s817_s21, 3  ;;  %s247_s15 = scalar_lea.vmem (!%p222_p10), [#allocation2], %s582_s11 }
  0x19   : > { %s401_s16 = sshll.u32 (!%p222_p10), %s247_s15, 4  ;;  %s417_s29 = scalar_lea.hbm (!%p222_p10), %s1078_s4, %s598_s13  ;;  %s984_s16 = int_to_ptr.vmem [resolvable:$true] %s401_s16 }
  0x1a   : > { %v827_v0 = vmov 0   ;;  %s263_s7 = scalar_select %p262_p11, %s817_s21, 1  ;;  %v284_v1 = vld [vmem:[%s1086_s2 + $0x20] sm:$0xff]  ;;  %v281_v2 = vld [vmem:[%s1086_s2 + $0x8] sm:$0xff]  ;;  %v283_v3 = vld [vmem:[%s1086_s2 + $0x18] sm:$0xff]  ;;  %vm316_vm0 = vcmask 261120  }
  0x1b   : > { %685 = vset.pattern.permute.xlu1 %v827_v0  ;;  %684 = vset.pattern.permute.xlu0 %v827_v0  ;;  %v282_v11 = vld [vmem:[%s1086_s2 + $0x10] sm:$0xff]  ;;  %v280_v13 = vld [vmem:[%s1086_s2] sm:$0xff]  ;;  %v285_v14 = vld [vmem:[%s1086_s2 + $0x28] sm:$0xff]  ;;  %vm370_vm1 = vcmask 523264   ;;  %s992_s8 = scalar_lea.hbm %s1079_s5, %s598_s13 }
  0x1c   : > { %686 = vset.pattern.permute.xlu2 %v827_v0  ;;  %308 = vperm.xlu0 %684, %v284_v1   ;;  %s602_s14 = sshll.u32 %s263_s7, 5  ;;  %v271_v8 = vld [vmem:[%s1088_s1 + $0x8] sm:$0xff]  ;;  %v273_v9 = vld [vmem:[%s1088_s1 + $0x18] sm:$0xff]  ;;  %v274_v10 = vld [vmem:[%s1088_s1 + $0x20] sm:$0xff]  ;;  %s979_s7 = sand.u32 1, %s577_s24  }
  0x1d   : > { %293 = vperm.xlu1 %685, %v281_v2   ;;  %303 = vperm.xlu2 %686, %v283_v3   ;;  %s269_s17 = scalar_lea.vmem %s1087_s0, %s602_s14  ;;  %v270_v12 = vld [vmem:[%s1088_s1] sm:$0xff]  ;;  %v272_v15 = vld [vmem:[%s1088_s1 + $0x10] sm:$0xff]  ;;  %v275_v16 = vld [vmem:[%s1088_s1 + $0x28] sm:$0xff]  ;;  %s603_s14 = sshll.u32 %s817_s21, 5 }
  0x1e   : > { %v279_v4 = vld [vmem:[%s269_s17 + $0x18] sm:$0xff]  ;;  %v278_v5 = vld [vmem:[%s269_s17 + $0x10] sm:$0xff]  ;;  %v277_v6 = vld [vmem:[%s269_s17 + $0x8] sm:$0xff]  ;;  %s400_s25 = scalar_lea.hbm %s1077_s3, %s603_s14  ;;  %s254_s21 = scalar_lea.vmem [#allocation4], %s583_s12 }
  0x1f   : > { %604 = vmatpush.msra.mxu1 %v279_v4  ;;  %605 = vmatpush.msra.mxu2 %v279_v4  ;;  %v276_v7 = vld [vmem:[%s269_s17] sm:$0xff]  ;;  %s419_s11 = sshll.u32 %s254_s21, 4  ;;  %s421_s17 = sshll.u32 %s417_s29, 4  ;;  %s420_s11 = int_to_ptr.vmem [resolvable:$true] %s419_s11  ;;  %s422_s17 = int_to_ptr.hbm [resolvable:$true] %s421_s17 }
  0x20   : > { %606 = vmatpush.msra.mxu3 %v279_v4  ;;  %347 = vmatpush.msra.mxu0 %v279_v4  ;;  %s403_s24 = sshll.u32 %s400_s25, 4  ;;  %s1001_s25 = scalar_lea.vmem [#allocation6], %s583_s12  ;;  %s996_s24 = int_to_ptr.hbm [resolvable:$true] %s403_s24 }
  0x21   : > { %607 = vmatpush.msra.mxu1 %v278_v5  ;;  %608 = vmatpush.msra.mxu2 %v278_v5  ;;  %s434_s29 = sshll.u32 %s1001_s25, 4  ;;  %s383_s0 = scalar_lea.sflag [#allocation5], %s979_s7  ;;  %s435_s29 = int_to_ptr.vmem [resolvable:$true] %s434_s29 }
  0x22   : > { %609 = vmatpush.msra.mxu3 %v278_v5  ;;  %348 = vmatpush.msra.mxu0 %v278_v5  ;;  %s701_s14 = sshra.s32 %s422_s17, 4  ;;  %s707_s1 = scalar_lea.hbm %s1078_s4, 16  ;;  %s702_s14 = int_to_ptr.hbm [resolvable:$true] %s701_s14 }
  0x23   : > { %610 = vmatpush.msra.mxu1 %v277_v6  ;;  %611 = vmatpush.msra.mxu2 %v277_v6  ;;  %s703_s13 = scalar_lea.hbm %s702_s14, 8  ;;  %p708_p1 = scmp.lt.s32.totalorder %s702_s14, %s1078_s4 }
  0x24   : > { %612 = vmatpush.msra.mxu3 %v277_v6  ;;  %349 = vmatpush.msra.mxu0 %v277_v6  ;;  %p704_p12 = scmp.ne.s32.totalorder %s702_s14, %s703_s13  ;;  %p709_p2 = scmp.lt.s32.totalorder %s707_s1, %s703_s13 }
  0x25   : > { %613 = vmatpush.msra.mxu1 %v276_v7  ;;  %614 = vmatpush.msra.mxu2 %v276_v7 }
  0x26   : > { %615 = vmatpush.msra.mxu3 %v276_v7  ;;  %588 = vmatmul.msk.f32.vlgmr.msra.gmra.mxu1 %vm316_vm0, %v271_v8  ;;  %p705_p13 = pnand %p704_p12, %p902_p4  ;;  %p710_p3 = por %p709_p2, %p708_p1 }
  0x27   : > { %590 = vmatmul.msk.f32.vlgmr.msra.gmra.mxu2 %vm316_vm0, %v273_v9  ;;  %591 = vmatmul.msk.f32.vlgmr.msra.gmra.mxu3 %vm316_vm0, %v274_v10 }
  0x28   : > { %350 = vmatpush.msra.mxu0 %v276_v7  ;;  %298 = vperm.xlu1 %685, %v282_v11   ;;  %p706_p0 = pneg %p705_p13 }
  0x29   : > { %587 = vmatmul.msk.f32.vlgmr.msra.gmra.mxu0 %vm316_vm0, %v270_v12  ;;  %288 = vperm.xlu0 %684, %v280_v13  }
  0x2a   : > { %313 = vperm.xlu2 %686, %v285_v14   ;;  %p711_p5 = pnand %p710_p3, %p706_p0 }
  0x2e   : > { %589 = vmatmul.msk.f32.gmra.mxu1 %vm316_vm0, %v272_v15 }
  0x2f   : > { %592 = vmatmul.msk.f32.gmra.mxu3 %vm316_vm0, %v275_v16 }
  0x77   : > { %v304_v24 = vpop.permute.xlu2 %303 }
  0x8e   : > { %v309_v17 = vpop.permute.xlu0 %308 }
  0x8f   : > { %v294_v18 = vpop.permute.xlu1 %293 }
  0x9a   : > { %v299_v27 = vpop.permute.xlu1 %298 }
  0x9b   : > { %v289_v21 = vpop.permute.xlu0 %288 }
  0xa3   : > { %v355_v19 = vpop.f32.mrf.mxu1 }
  0xa4   : > { %v356_v20 = vadd.f32 %v355_v19, %v294_v18 }
  0xa6   : > { %372 = vst.msk [vmem:[%s247_s15 + $0x8] sm:$0xff] %vm370_vm1, %v356_v20  ;;  %v352_v22 = vpop.f32.mrf.mxu0 }
  0xa7   : > { %v353_v23 = vadd.f32 %v352_v22, %v289_v21 }
  0xa9   : > { %371 = vst.msk [vmem:[%s247_s15] sm:$0xff] %vm370_vm1, %v353_v23 }
  0xaa   : > { %v361_v25 = vpop.f32.mrf.mxu2  ;;  %v364_v26 = vpop.f32.mrf.mxu3 }
  0xab   : > { %v362_v28 = vadd.f32 %v361_v25, %v304_v24  ;;  %v365_v29 = vadd.f32 %v364_v26, %v309_v17  ;;  %v358_v30 = vpop.f32.mrf.mxu1 }
  0xac   : > { %v359_v31 = vadd.f32 %v358_v30, %v299_v27 }
  0xad   : > { %374 = vst.msk [vmem:[%s247_s15 + $0x18] sm:$0xff] %vm370_vm1, %v362_v28 }
  0xae   : > { %373 = vst.msk [vmem:[%s247_s15 + $0x10] sm:$0xff] %vm370_vm1, %v359_v31 }
  0xaf   : > { %375 = vst.msk [vmem:[%s254_s21] sm:$0xff] %vm370_vm1, %v365_v29 }
  0xb0   : > { %714 = shalt.err (!%p711_p5)
}
  0xb1   : > { %617 = dma.vmem_to_hbm [thread:$0]  (%p902_p4), %s420_s11, 128, %s422_s17, %s383_s0  }
  0xb2   : > { %s378_s12 = scalar_lea.sflag [#allocation3], %s967_s10  ;;  %s729_s9 = sshra.s32 %s996_s24, 4  ;;  %s730_s9 = int_to_ptr.hbm [resolvable:$true] %s729_s9 }
  0xb3   : > { %s731_s27 = scalar_lea.hbm %s730_s9, 32  ;;  %s735_s14 = scalar_lea.hbm %s1077_s3, 64 }
  0xb4   : > { %p732_p6 = scmp.ne.s32.totalorder %s730_s9, %s731_s27  ;;  %p736_p10 = scmp.lt.s32.totalorder %s730_s9, %s1077_s3 }
  0xb5   : > { %p737_p11 = scmp.lt.s32.totalorder %s735_s14, %s731_s27 }
  0xb6   : > { %p733_p7 = pnand %p732_p6, %p902_p4 }
  0xb7   : > { %p738_p12 = por %p737_p11, %p736_p10 }
  0xb8   : > { %p734_p9 = pneg %p733_p7 }
  0xba   : > { %p739_p13 = pnand %p738_p12, %p734_p9 }
  0xbc   : > { %742 = shalt.err (!%p739_p13)
}
  0xbd   : > { %s828_s10 = smov 128   ;;  %s829_s11 = smov 8   ;;  %v314_v32 = vpop.permute.xlu2 %313  ;;  %v367_v33 = vpop.f32.mrf.mxu3 }
  0xbe   : > { %616 = dma.vmem_to_hbm [thread:$0]  (%p902_p4), %s984_s16, 512, %s996_s24, %s378_s12, %s828_s10, %s828_s10, %s829_s11   ;;  %v368_v34 = vadd.f32 %v367_v33, %v314_v32 }
  0xbf   : > { %s1089_s17 = sshll.u32 %s992_s8, 4  ;;  %s763_s16 = scalar_lea.hbm %s1079_s5, 16  ;;  %s437_s17 = int_to_ptr.hbm [resolvable:$true] %s1089_s17 }
  0xc0   : > { %376 = vst.msk [vmem:[%s1001_s25] sm:$0xff] %vm370_vm1, %v368_v34  ;;  %s757_s9 = sshra.s32 %s437_s17, 4  ;;  %s758_s9 = int_to_ptr.hbm [resolvable:$true] %s757_s9 }
  0xc1   : > { %s759_s21 = scalar_lea.hbm %s758_s9, 8  ;;  %p764_p3 = scmp.lt.s32.totalorder %s758_s9, %s1079_s5 }
  0xc2   : > { %p760_p0 = scmp.ne.s32.totalorder %s758_s9, %s759_s21  ;;  %p765_p5 = scmp.lt.s32.totalorder %s763_s16, %s759_s21 }
  0xc4   : > { %p761_p1 = pnand %p760_p0, %p902_p4  ;;  %p766_p6 = por %p765_p5, %p764_p3 }
  0xc6   : > { %p762_p2 = pneg %p761_p1 }
  0xc8   : > { %p767_p7 = pnand %p766_p6, %p762_p2 }
  0xca   : > { %770 = shalt.err (!%p767_p7)
}
  0xcb   : > { %618 = dma.vmem_to_hbm [thread:$0]  (%p902_p4), %s435_s29, 128, %s437_s17, %s383_s0  }
  0xcc PF: > { %p632_p9 = scmp.ge.s32.totalorder %s825_s23, 2  ;;  %s448_s8 = sand.u32 1, %s805_s18  }
  0xcd   : > { %s449_s25 = scalar_lea.sflag [#allocation3], %s448_s8 }
  0xce   : > { %p623_p10 = pnand %p632_p9, %p911_p8 }
  0xd0   : > { %p624_p11 = pneg %p623_p10 }
  0xd2   : > { %796 = dma.done.wait (%p624_p11), %s449_s25, 512  }
  0xd3   : > { %798 = vsyncadd (%p624_p11), %s449_s25, 4294966784  ;;  %s1090_s2 = sadd.s32 4294967294, %s825_s23  }
  0xd4   : > { %s458_s14 = sand.u32 1, %s1090_s2  }
  0xd5   : > { %s459_s13 = scalar_lea.sflag [#allocation5], %s458_s14 }
  0xd6   : > { %800 = dma.done.wait (%p624_p11), %s459_s13, 256  }
  0xd7   : > { %802 = vsyncadd (%p624_p11), %s459_s13, 4294967040  ;;  %s22_s23 = sadd.s32 1, %s825_s23   ;;  %s1091_s18 = smov %s809_s19 }
  0xd8   : > { %p19_p4 = scmp.ge.s32.totalorder %s22_s23, 4   ;;  %s1092_s19 = smov %s813_s20 }
  0xd9   : > { %s1093_s20 = smov %s917_s6  ;;  %s1094_s21 = smov %s821_s22 }
  0xda   : > { %s1095_s22 = smov %s1097_s26  ;;  %21 = sbr.rel (!%p19_p4) target bundleno = 10 (0xa), region = 99 }
  0xdf   :  { %475 = vsyncpa [#allocation3], 1 }
  0xe0   :  { %477 = vsyncpa [#allocation3 + $0x1], 1 }
  0xe1   :  { %478 = vsyncpa [#allocation5], 1 }
  0xe2   :  { %480 = vsyncpa [#allocation5 + $0x1], 1 }

</bundles_post_ra>
